<compile_context>
chip_gen: v7x
topology: tpu7x:2x2x1
jax: 0.10.0
libtpu: 0.0.40
codegen_flags: <defaults>
</compile_context>

<pallas_src>
import functools

import jax
import jax.numpy as jnp
from jax.experimental import pallas as pl
from jax.experimental.pallas import tpu as pltpu


_R_MAX = 1024  # cap on fused row-block (batches_per_block * C); bounds block-diag weight size


# ---------------------------------------------------------------------------
# Kernels
# ---------------------------------------------------------------------------

def _fused_kernel(x_ref, w1_ref, b1_ref, w2_ref, b2_ref, o_ref, *, inv_hw):
    """One row-block (an integer number of samples): pool -> block-diag MLP -> multiply."""
    xv = x_ref[...]                                                      # (R, HW), input dtype
    # Global average pool per row, accumulated in f32; HW is the full extent so no lane
    # padding can leak into the sum.
    pooled = jnp.sum(xv.astype(jnp.float32), axis=1, keepdims=True) * inv_hw     # (R, 1)
    # 1x1 convs in column-vector form with block-diagonal kron(I, W) weights:
    # per-sample (C,C)@(C,1) math, no in-kernel reshapes or transposes.
    a1 = jnp.dot(w1_ref[...], pooled, preferred_element_type=jnp.float32) + b1_ref[...]
    a1 = jnp.maximum(a1, 0.0)
    a2 = jnp.dot(w2_ref[...], a1, preferred_element_type=jnp.float32) + b2_ref[...]
    att = jax.nn.sigmoid(a2)                                             # (R, 1) f32
    # Broadcast multiply in the input dtype (only the tiny (R,1) attention is cast).
    o_ref[...] = xv * att.astype(o_ref.dtype)


def _pool_kernel(x_ref, mean_ref, acc_sc, *, hw, thw, inv_hw):
    """Two-pass fallback, pass 1: HW-tiled per-row mean (no weights on this hot path)."""
    h = pl.program_id(1)

    @pl.when(h == 0)
    def _():
        acc_sc[...] = jnp.zeros_like(acc_sc)

    xv = x_ref[...].astype(jnp.float32)                                  # (tr, thw)
    if hw % thw != 0:
        # Static condition: only generate the tail mask when HW is ragged.  Lanes past the
        # true HW in the boundary block are undefined -> zero them before accumulating.
        lane = jax.lax.broadcasted_iota(jnp.int32, xv.shape, 1) + h * thw
        xv = jnp.where(lane < hw, xv, 0.0)
    acc_sc[...] += jnp.sum(xv, axis=1, keepdims=True)

    @pl.when(h == pl.num_programs(1) - 1)
    def _():
        mean_ref[...] = acc_sc[...] * inv_hw


def _mul_kernel(x_ref, att_ref, o_ref):
    """Two-pass fallback, pass 2: tiled per-row broadcast multiply in the input dtype."""
    o_ref[...] = x_ref[...] * att_ref[...].astype(o_ref.dtype)


# ---------------------------------------------------------------------------
# Sizing helpers
# ---------------------------------------------------------------------------

def _sublane_multiple(itemsize):
    return {1: 32, 2: 16}.get(itemsize, 8)


def _vmem_budget_bytes():
    """Generation-aware VMEM budget (~80% of physical: ~102MiB v5e/v6e, ~51MiB v7x)."""
    cap = 64 << 20                          # conservative fallback (v7x per-core VMEM)
    try:
        cap = int(getattr(pltpu.get_tpu_info(), "vmem_capacity_bytes", cap))
    except Exception:
        pass
    return max(16 << 20, (cap * 4) // 5)


def _choose_bpb(N, C, HW, itemsize, mult, budget):
    """Batches per fused row-block, or None to use the two-pass path."""
    per_block = max(1 << 20, (budget - (2 << 20)) // 4)   # x-in + out, double-buffered

    def fits(b):
        r = b * C
        return (r <= _R_MAX
                and r * HW * itemsize <= per_block
                and 2 * r * r * 4 <= budget // 8)          # block-diagonal f32 weights

    bmax = min(N, max(1, _R_MAX // max(C, 1)))
    while bmax >= 1 and not fits(bmax):
        bmax -= 1                                          # bounded by _R_MAX // C
    if bmax < 1:
        return None

    def aligned(cap):
        # bpb*C must be a multiple of the sublane tile (or equal the full row extent).
        for b in range(min(cap, bmax), 0, -1):
            if (b * C) % mult == 0:
                return b
        return None

    bpb = N if bmax == N else aligned(bmax)   # full-rows block needs no sublane alignment
    if bpb is None:
        return None

    total = N * C * HW * itemsize
    # Prefer >=2 grid steps for sizeable tensors (DMA/compute overlap, megacore / v7x dual-TC).
    if N >= 2 and -(-N // bpb) == 1 and total >= (2 << 20):
        b2 = aligned(-(-N // 2))
        if b2 is not None:
            bpb = b2
    # A single-sample fused grid cannot be split across cores; big N==1 slabs are better
    # served by the (rows, hw)-parallel two-pass grid (v7x dual-TC).
    if N == 1 and total >= (8 << 20):
        return None
    return bpb


def _pick_hw_tile(hw, tr, itemsize, budget):
    """HW tile (lanes) for the two-pass path; cdiv grid, no divisibility requirement."""
    if hw <= 128:
        return hw, 1                                        # full extent, single tile
    blk_budget = max(1 << 20, budget // 8)                  # per double-buffered (tr, thw) block
    max_lanes = max(128, (blk_budget // max(1, tr * itemsize)) // 128 * 128)
    thw = min(max_lanes, (hw // 128) * 128, 2048)
    return thw, -(-hw // thw)


# ---------------------------------------------------------------------------
# Wrapper
# ---------------------------------------------------------------------------

def channel_attention(x, w1, b1, w2, b2, *, force_two_pass=False):
    """x: (N, C, H, W); w1, w2: (C, C); b1, b2: any shape of size C."""
    N, C, H, W = x.shape
    HW = H * W
    rows = N * C
    itemsize = jnp.dtype(x.dtype).itemsize
    mult = _sublane_multiple(itemsize)
    inv_hw = 1.0 / float(HW)
    budget = _vmem_budget_bytes()

    # Fold C into the sublane dimension: (N, C, H, W) -> (N*C, HW).  No pad / slice.
    x2 = x.reshape(rows, HW)

    w1f = w1.astype(jnp.float32)
    w2f = w2.astype(jnp.float32)
    b1f = b1.reshape(-1).astype(jnp.float32)
    b2f = b2.reshape(-1).astype(jnp.float32)

    bpb = None if force_two_pass else _choose_bpb(N, C, HW, itemsize, mult, budget)

    if bpb is not None:
        # ------------------ fused single-pass path (2 HBM passes) ------------------
        R = bpb * C
        steps = -(-N // bpb)                                # cdiv; boundary row-blocks are safe
        eye = jnp.eye(bpb, dtype=jnp.float32)
        w1bd = jnp.kron(eye, w1f)                           # (R, R) block-diagonal
        w2bd = jnp.kron(eye, w2f)
        b1bd = jnp.tile(b1f, bpb).reshape(R, 1)
        b2bd = jnp.tile(b2f, bpb).reshape(R, 1)

        out2 = pl.pallas_call(
            functools.partial(_fused_kernel, inv_hw=inv_hw),
            out_shape=jax.ShapeDtypeStruct((rows, HW), x.dtype),
            grid_spec=pltpu.PrefetchScalarGridSpec(
                num_scalar_prefetch=0,
                grid=(steps,),
                in_specs=[
                    pl.BlockSpec((R, HW), lambda r: (r, 0)),   # x rows for bpb samples
                    pl.BlockSpec((R, R), lambda r: (0, 0)),    # kron(I, w1)
                    pl.BlockSpec((R, 1), lambda r: (0, 0)),    # tiled b1 (column)
                    pl.BlockSpec((R, R), lambda r: (0, 0)),    # kron(I, w2)
                    pl.BlockSpec((R, 1), lambda r: (0, 0)),    # tiled b2 (column)
                ],
                out_specs=pl.BlockSpec((R, HW), lambda r: (r, 0)),
            ),
            compiler_params=pltpu.CompilerParams(
                dimension_semantics=("parallel",),
                vmem_limit_bytes=int(budget),
            ),
        )(x2, w1bd, b1bd, w2bd, b2bd)
        return out2.reshape(N, C, H, W)

    # ------------------ two-pass fallback (large slabs / tiny-N on v7x) ------------------
    tr = rows if rows <= 256 else 256                       # 256 % {8,16,32} == 0
    nr = -(-rows // tr)
    thw, nh = _pick_hw_tile(HW, tr, itemsize, budget)

    # Pass 1: HW-tiled per-row mean (reduction axis last / "arbitrary").
    pooled = pl.pallas_call(
        functools.partial(_pool_kernel, hw=HW, thw=thw, inv_hw=inv_hw),
        out_shape=jax.ShapeDtypeStruct((rows, 1), jnp.float32),
        grid_spec=pltpu.PrefetchScalarGridSpec(
            num_scalar_prefetch=0,
            grid=(nr, nh),
            in_specs=[pl.BlockSpec((tr, thw), lambda r, h: (r, h))],
            out_specs=pl.BlockSpec((tr, 1), lambda r, h: (r, 0)),
            scratch_shapes=[pltpu.VMEM((tr, 1), jnp.float32)],
        ),
        compiler_params=pltpu.CompilerParams(
            dimension_semantics=("parallel", "arbitrary"),
            vmem_limit_bytes=int(budget),
        ),
    )(x2)

    # Tiny per-sample MLP as one batched (N,C)@(C,C) matmul (negligible; plain JAX).
    pooled_nc = pooled.reshape(N, C)
    a1 = jnp.maximum(pooled_nc @ w1f.T + b1f[None, :], 0.0)
    att = jax.nn.sigmoid(a1 @ w2f.T + b2f[None, :]).reshape(rows, 1)

    # Pass 2: fully parallel tiled broadcast multiply.
    out2 = pl.pallas_call(
        _mul_kernel,
        out_shape=jax.ShapeDtypeStruct((rows, HW), x.dtype),
        grid_spec=pltpu.PrefetchScalarGridSpec(
            num_scalar_prefetch=0,
            grid=(nr, nh),
            in_specs=[
                pl.BlockSpec((tr, thw), lambda r, h: (r, h)),
                pl.BlockSpec((tr, 1), lambda r, h: (r, 0)),
            ],
            out_specs=pl.BlockSpec((tr, thw), lambda r, h: (r, h)),
        ),
        compiler_params=pltpu.CompilerParams(
            dimension_semantics=("parallel", "parallel"),
            vmem_limit_bytes=int(budget),
        ),
    )(x2, att)
    return out2.reshape(N, C, H, W)


# ---------------------------------------------------------------------------
# Reference + test
# ---------------------------------------------------------------------------

def reference(x, w1, b1, w2, b2):
    pooled = jnp.mean(x, axis=(2, 3))                          # (N, C)
    a1 = jnp.maximum(pooled @ w1.T + b1[None, :], 0.0)
    att = jax.nn.sigmoid(a1 @ w2.T + b2[None, :])
    return x * att[:, :, None, None]


if __name__ == "__main__":
    N, C, H, W = 2, 4, 16, 16

    key = jax.random.PRNGKey(0)
    kx, k1, k2, k3, k4 = jax.random.split(key, 5)

    x = jax.random.normal(kx, (N, C, H, W), dtype=jnp.float32)

    # Conv2d(kernel_size=1) -> weights (C, C), bias (C,)
    bound = 1.0 / jnp.sqrt(jnp.float32(C))
    w1 = jax.random.uniform(k1, (C, C), jnp.float32, -bound, bound)
    b1 = jax.random.uniform(k2, (C,), jnp.float32, -bound, bound)
    w2 = jax.random.uniform(k3, (C, C), jnp.float32, -bound, bound)
    b2 = jax.random.uniform(k4, (C,), jnp.float32, -bound, bound)

    ref = reference(x, w1, b1, w2, b2)

    # Primary fused path.
    out = jax.block_until_ready(channel_attention(x, w1, b1, w2, b2))
    assert out.shape == (N, C, H, W)
    assert jnp.allclose(out, ref, atol=2e-5, rtol=2e-5), "fused path mismatch vs reference"

    # Two-pass fallback path (large slabs / tiny-N dual-TC case).
    out2 = jax.block_until_ready(channel_attention(x, w1, b1, w2, b2, force_two_pass=True))
    assert jnp.allclose(out2, ref, atol=2e-5, rtol=2e-5), "two-pass path mismatch vs reference"

    # HW not a multiple of 128: fused path with a full-extent (ragged) last block dim.
    x_odd = jax.random.normal(kx, (N, C, 7, 7), dtype=jnp.float32)
    ref_odd = reference(x_odd, w1, b1, w2, b2)
    out3 = jax.block_until_ready(channel_attention(x_odd, w1, b1, w2, b2))
    assert jnp.allclose(out3, ref_odd, atol=2e-5, rtol=2e-5), "ragged-HW fused mismatch"

    # HW > 128 and not a multiple of the HW tile: exercises the masked tail in pass 1.
    x_rag = jax.random.normal(kx, (N, C, 20, 20), dtype=jnp.float32)
    ref_rag = reference(x_rag, w1, b1, w2, b2)
    out4 = jax.block_until_ready(channel_attention(x_rag, w1, b1, w2, b2, force_two_pass=True))
    assert jnp.allclose(out4, ref_rag, atol=2e-5, rtol=2e-5), "ragged-HW two-pass mismatch"

    print("KERNEL_OK")
</pallas_src>

<mosaic_0001>
module attributes {stable_mosaic.version = 11 : i64} {
  func.func @_fused_kernel(%arg0: i32, %arg1: memref<8x256xf32, #tpu.memory_space<vmem>>, %arg2: memref<8x8xf32, #tpu.memory_space<vmem>>, %arg3: memref<8x1xf32, #tpu.memory_space<vmem>>, %arg4: memref<8x8xf32, #tpu.memory_space<vmem>>, %arg5: memref<8x1xf32, #tpu.memory_space<vmem>>, %arg6: memref<8x256xf32, #tpu.memory_space<vmem>>) attributes {dimension_semantics = [#tpu.dimension_semantics<parallel>], iteration_bounds = array<i64: 1>, scalar_prefetch = 0 : i64, scratch_operands = 0 : i64, tpu.core_type = #tpu.core_type<tc>, window_params = [{transform_indices = @transform_0, window_bounds = array<i64: 8, 256>}, {pipeline_mode = #tpu.pipeline_mode<synchronous>, transform_indices = @transform_1, window_bounds = array<i64: 8, 8>}, {pipeline_mode = #tpu.pipeline_mode<synchronous>, transform_indices = @transform_2, window_bounds = array<i64: 8, 1>}, {pipeline_mode = #tpu.pipeline_mode<synchronous>, transform_indices = @transform_3, window_bounds = array<i64: 8, 8>}, {pipeline_mode = #tpu.pipeline_mode<synchronous>, transform_indices = @transform_4, window_bounds = array<i64: 8, 1>}, {transform_indices = @transform_5, window_bounds = array<i64: 8, 256>}]} {
    %c0 = arith.constant 0 : index
    %c0_0 = arith.constant 0 : index
    %0 = vector.load %arg1[%c0, %c0_0] : memref<8x256xf32, #tpu.memory_space<vmem>>, vector<8x256xf32>
    %cst = arith.constant dense<0.000000e+00> : vector<8xf32>
    %1 = vector.multi_reduction <add>, %0, %cst [1] : vector<8x256xf32> to vector<8xf32>
    %2 = vector.shape_cast %1 : vector<8xf32> to vector<8x1xf32>
    %cst_1 = arith.constant 3.906250e-03 : f32
    %3 = vector.broadcast %cst_1 : f32 to vector<8x1xf32>
    %4 = arith.mulf %2, %3 : vector<8x1xf32>
    %c0_2 = arith.constant 0 : index
    %c0_3 = arith.constant 0 : index
    %5 = vector.load %arg2[%c0_2, %c0_3] : memref<8x8xf32, #tpu.memory_space<vmem>>, vector<8x8xf32>
    %cst_4 = arith.constant dense<0.000000e+00> : vector<8x1xf32>
    %6 = tpu.matmul %5, %4, %cst_4 {dimension_numbers = #tpu.dot_dimension_numbers<[1], [0], [0], [1], [0, 0, 1, 1], [], []>} : vector<8x8xf32>, vector<8x1xf32>, vector<8x1xf32> -> vector<8x1xf32>
    %c0_5 = arith.constant 0 : index
    %c0_6 = arith.constant 0 : index
    %7 = vector.load %arg3[%c0_5, %c0_6] : memref<8x1xf32, #tpu.memory_space<vmem>>, vector<8x1xf32>
    %8 = arith.addf %6, %7 : vector<8x1xf32>
    %cst_7 = arith.constant 0.000000e+00 : f32
    %9 = vector.broadcast %cst_7 : f32 to vector<8x1xf32>
    %10 = arith.maximumf %8, %9 : vector<8x1xf32>
    %c0_8 = arith.constant 0 : index
    %c0_9 = arith.constant 0 : index
    %11 = vector.load %arg4[%c0_8, %c0_9] : memref<8x8xf32, #tpu.memory_space<vmem>>, vector<8x8xf32>
    %cst_10 = arith.constant dense<0.000000e+00> : vector<8x1xf32>
    %12 = tpu.matmul %11, %10, %cst_10 {dimension_numbers = #tpu.dot_dimension_numbers<[1], [0], [0], [1], [0, 0, 1, 1], [], []>} : vector<8x8xf32>, vector<8x1xf32>, vector<8x1xf32> -> vector<8x1xf32>
    %c0_11 = arith.constant 0 : index
    %c0_12 = arith.constant 0 : index
    %13 = vector.load %arg5[%c0_11, %c0_12] : memref<8x1xf32, #tpu.memory_space<vmem>>, vector<8x1xf32>
    %14 = arith.addf %12, %13 : vector<8x1xf32>
    %15 = arith.negf %14 : vector<8x1xf32>
    %16 = math.exp %15 : vector<8x1xf32>
    %cst_13 = arith.constant 1.000000e+00 : f32
    %17 = vector.broadcast %cst_13 : f32 to vector<8x1xf32>
    %18 = arith.addf %17, %16 : vector<8x1xf32>
    %19 = arith.divf %17, %18 : vector<8x1xf32>
    %20 = vector.broadcast %19 : vector<8x1xf32> to vector<8x256xf32>
    %21 = arith.mulf %0, %20 : vector<8x256xf32>
    %c0_14 = arith.constant 0 : index
    %c0_15 = arith.constant 0 : index
    %22 = vector.load %arg6[%c0_14, %c0_15] : memref<8x256xf32, #tpu.memory_space<vmem>>, vector<8x256xf32>
    tpu.vector_store %arg6[%c0_14, %c0_15], %21 {strides = array<i32>} : memref<8x256xf32, #tpu.memory_space<vmem>>, vector<8x256xf32>,
    return
  }
  func.func @transform_0(%arg0: i32) -> (i32, i32) {
    %c0_i32 = arith.constant 0 : i32
    %c0_i32_0 = arith.constant 0 : i32
    return %arg0, %c0_i32 : i32, i32
  }
  func.func @transform_1(%arg0: i32) -> (i32, i32) {
    %c0_i32 = arith.constant 0 : i32
    %c0_i32_0 = arith.constant 0 : i32
    %c0_i32_1 = arith.constant 0 : i32
    return %c0_i32, %c0_i32_0 : i32, i32
  }
  func.func @transform_2(%arg0: i32) -> (i32, i32) {
    %c0_i32 = arith.constant 0 : i32
    %c0_i32_0 = arith.constant 0 : i32
    %c0_i32_1 = arith.constant 0 : i32
    return %c0_i32, %c0_i32_0 : i32, i32
  }
  func.func @transform_3(%arg0: i32) -> (i32, i32) {
    %c0_i32 = arith.constant 0 : i32
    %c0_i32_0 = arith.constant 0 : i32
    %c0_i32_1 = arith.constant 0 : i32
    return %c0_i32, %c0_i32_0 : i32, i32
  }
  func.func @transform_4(%arg0: i32) -> (i32, i32) {
    %c0_i32 = arith.constant 0 : i32
    %c0_i32_0 = arith.constant 0 : i32
    %c0_i32_1 = arith.constant 0 : i32
    return %c0_i32, %c0_i32_0 : i32, i32
  }
  func.func @transform_5(%arg0: i32) -> (i32, i32) {
    %c0_i32 = arith.constant 0 : i32
    %c0_i32_0 = arith.constant 0 : i32
    return %arg0, %c0_i32 : i32, i32
  }
}

</mosaic_0001>

<bundles_post_ra>
// kernel: tpu_custom_call.1
= control target key start
LH: loop header
LB: loop body
LE: loop exit
PB: predicated region body
PF: predicated region fallthrough
CT: control target
= control target key end

     0   :  { %10 = vsyncpa [#allocation3], 0  ;;  %s370_s0 = inlined_call_operand.vmem [shape: f32[8,256], index: 0, kind: input, shape index: {}]   ;;  %s371_s1 = inlined_call_operand.hbm [shape: f32[8,8], index: 1, kind: input, shape index: {}]   ;;  %s372_s2 = inlined_call_operand.vmem [shape: f32[8,1], index: 2, kind: input, shape index: {}]   ;;  %s373_s3 = inlined_call_operand.vmem [shape: f32[8,8], index: 3, kind: input, shape index: {}]   ;;  %s374_s4 = inlined_call_operand.vmem [shape: f32[8,1], index: 4, kind: input, shape index: {}]   ;;  %s375_s5 = inlined_call_operand.hbm [shape: f32[8,256], index: 5, kind: output, shape index: {}]  }
   0x1   :  { %11 = vsyncpa [#allocation4], 0  ;;  %s296_s18 = smov [#allocation2]   ;;  %s248_s22 = scalar_lea.hbm %s371_s1, 128 }
   0x2   :  { %s20_s19 = sshll.u32 %s296_s18, 4  ;;  %p249_p0 = scmp.ne.s32.totalorder %s371_s1, %s248_s22  ;;  %s21_s19 = int_to_ptr.vmem [resolvable:$true] %s20_s19 }
   0x3   :  { %p252_p1 = scmp.lt.u32.totalorder %s248_s22, %s371_s1 }
   0x5   :  { %p254_p2 = pnand %p252_p1, %p249_p0 }
   0x7   :  { %257 = shalt.err (!%p254_p2)
}
   0x8   :  { %s258_s27 = scalar_lea.vmem %s21_s19, 128  ;;  %p263_p4 = scmp.lt.s32.totalorder %s21_s19, %s21_s19 }
   0x9   :  { %p259_p3 = scmp.ne.s32.totalorder %s21_s19, %s258_s27  ;;  %p264_p5 = scmp.lt.s32.totalorder %s258_s27, %s258_s27 }
   0xb   :  { %p265_p6 = por %p264_p5, %p263_p4 }
   0xd   :  { %p266_p7 = pnand %p265_p6, %p259_p3 }
   0xf   :  { %269 = shalt.err (!%p266_p7)
}
  0x10   :  { %23 = dma.hbm_to_vmem [thread:$0]  %s371_s1, 128, %s21_s19, [#allocation3]  }
  0x11   :  { %292 = dma.done.wait [#allocation3], 128  }
  0x12   :  { %293 = vsyncadd [#allocation3], 4294967168  ;;  %v33_v0 = vld [vmem:[%s370_s0] sm:$0xff]  ;;  %v34_v1 = vld [vmem:[%s370_s0 + $0x8] sm:$0xff]  ;;  %v297_v3 = vmov 0.0   ;;  %vm298_vm0 = vmmov 0  }
  0x13   :  { %v35_v2 = vadd.f32 %v34_v1, %v33_v0  ;;  %228 = vmatprep.subr.mxu0 %v297_v3  ;;  %233 = vmatprep.subr.mxu1 %v297_v3  ;;  %v39_v6 = vld [vmem:[#allocation2] sm:$0xff]  ;;  %vm41_vm1 = vcmask 64512   ;;  %v299_v13 = vmov 0  }
  0x14   :  { %230 = vmatprep.mubr.msk.f32.mxu0 %vm298_vm0, %v297_v3  ;;  %235 = vmatprep.mubr.msk.f32.mxu1 %vm298_vm0, %v297_v3  ;;  %v40_v7 = vld [vmem:[%s372_s2] sm:$0xff]  ;;  %s300_s2 = smov [#allocation5]  }
  0x15   :  { %36 = vadd.xlane.f32.xlu0 %v35_v2  ;;  %v116_v12 = vld [vmem:[%s373_s3] sm:$0xff]  ;;  %s212_s3 = sshll.u32 %s300_s2, 4  ;;  %s213_s3 = int_to_ptr.vmem [resolvable:$true] %s212_s3 }
  0x16   :  { %243 = vset.pattern.permute.xlu0 %v299_v13  ;;  %v117_v14 = vld [vmem:[%s374_s4] sm:$0xff]  ;;  %s270_s13 = scalar_lea.vmem %s213_s3, 256  ;;  %p275_p9 = scmp.lt.s32.totalorder %s213_s3, %s213_s3 }
  0x17   :  { %p271_p8 = scmp.ne.s32.totalorder %s213_s3, %s270_s13  ;;  %p276_p10 = scmp.lt.s32.totalorder %s270_s13, %s270_s13 }
  0x19   :  { %p277_p11 = por %p276_p10, %p275_p9 }
  0x1b   :  { %p278_p12 = pnand %p277_p11, %p271_p8 }
  0xa2   :  { %v37_v4 = vpop.xlane.xlu0 %36 }
  0xa3   :  { %v38_v5 = vmul.f32 0.00390625, %v37_v4 }
  0xa5   :  { %229 = vmatpush3.msra.mxu0 %v38_v5 }
  0xa6   :  { %231 = vmatmul.mubr.msk.f32.vlgmr.msra.gmra.mrb[0].mxu0 %vm41_vm1, %v39_v6 }
 0x179   :  { %v111_v8 = vpop.f32.mrb[0].mxu0 }
 0x17a   :  { %v112_v9 = vadd.f32 %v111_v8, %v40_v7  ;;  %v232_v10 = vpop.f32.mrb[1].mxu0 }
 0x17c   :  { %v115_v11 = vmax.f32 %v112_v9, 0.0 }
 0x17e   :  { %234 = vmatpush3.msra.mxu1 %v115_v11 }
 0x17f   :  { %236 = vmatmul.mubr.msk.f32.vlgmr.msra.gmra.mrb[0].mxu1 %vm41_vm1, %v116_v12 }
 0x252   :  { %v187_v15 = vpop.f32.mrb[0].mxu1 }
 0x253   :  { %v188_v16 = vadd.f32 %v187_v15, %v117_v14  ;;  %v237_v17 = vpop.f32.mrb[1].mxu1 }
 0x255   :  { %v223_v18 = vmul.f32 -1.442695, %v188_v16 }
 0x257   :  { %244 = vpow2.f32 %v223_v18 }
 0x261   :  { %v245_v19 = vpop.eup %244 }
 0x262   :  { %v194_v20 = vadd.f32 1.0, %v245_v19 }
 0x264   :  { %246 = vrcp.f32 %v194_v20 }
 0x26e   :  { %v247_v21 = vpop.eup %246 }
 0x26f   :  { %199 = vperm.xlu0 %243, %v247_v21  }
 0x2ee   :  { %v200_v22 = vpop.permute.xlu0 %199 }
 0x2ef   :  { %v202_v23 = vmul.f32 %v200_v22, %v33_v0  ;;  %v203_v24 = vmul.f32 %v200_v22, %v34_v1 }
 0x2f1   :  { %204 = vst [vmem:[#allocation5] sm:$0xff] %v202_v23  ;;  %205 = vst [vmem:[#allocation5 + $0x8] sm:$0xff] %v203_v24 }
 0x2f2   :  { %281 = shalt.err (!%p278_p12)
}
 0x2f3   :  { %s282_s15 = scalar_lea.hbm %s375_s5, 256 }
 0x2f4   :  { %p283_p13 = scmp.ne.s32.totalorder %s375_s5, %s282_s15  ;;  %p286_p0 = scmp.lt.u32.totalorder %s282_s15, %s375_s5 }
 0x2f6   :  { %p288_p1 = pnand %p286_p0, %p283_p13 }
 0x2f8   :  { %291 = shalt.err (!%p288_p1)
}
 0x2f9   :  { %215 = dma.vmem_to_hbm [thread:$0]  %s213_s3, 256, %s375_s5, [#allocation4]  }
 0x2fa   :  { %294 = dma.done.wait [#allocation4], 256  }
 0x2fb   :  { %295 = vsyncadd [#allocation4], 4294967040 }
 0x2fc   :  { %219 = vsyncpa [#allocation3], 1 }
 0x2fd   :  { %220 = vsyncpa [#allocation4], 1 }

</bundles_post_ra>
